<compile_context>
chip_gen: v5e
topology: v5e:2x2
jax: 0.10.0
libtpu: 0.0.40
codegen_flags: <defaults>
</compile_context>

<pallas_src>
import functools

import numpy as np
import jax
import jax.numpy as jnp
from jax.experimental import pallas as pl
from jax.experimental.pallas import tpu as pltpu

# ----------------------- module-consistent hyper-parameters -----------------------
DATA_SIZE     = 16          # window_size (power of 2 >= 16 so layer_num >= 1)
INPUT_CHANNEL = 4
LATENT_SIZE   = 8
HIDDEN_SIZE   = 32          # ctor arg of the module; unused by its forward
PRED_STEPS    = 8
BATCH         = 2

LAYER_NUM   = int(np.log2(DATA_SIZE)) - 3   # 1
MAX_CHANNEL = DATA_SIZE * 2                 # 32
FINAL_SIZE  = 4
BN_EPS      = 1e-5
PRED_OUT    = PRED_STEPS * INPUT_CHANNEL    # 32
LANE_PAD    = 128                           # lane-dense width for the final store


# --------------------------------- Pallas kernel ---------------------------------
def _decoder_kernel(*refs, n_inner):
    """Fused decoder chain; all operands live whole in VMEM.

    refs layout (inputs..., output):
      z, lin_w, lin_b,
      [M_i, scale_i, shift_i] * n_inner,       # deconv-as-matmul + BN affine + ReLU
      M_last, shift_last,                      # last deconv + Tanh
      pred_w_pad, pred_b_pad,                  # prediction head (N padded to 128)
      out
    """
    out_ref = refs[-1]
    z_ref, lin_w_ref, lin_b_ref = refs[0], refs[1], refs[2]

    # linear_layers: Linear + ReLU  -> flat layout col = channel*FINAL_SIZE + pos
    h = jnp.dot(z_ref[...], lin_w_ref[...], preferred_element_type=jnp.float32)
    h = jnp.maximum(h + lin_b_ref[...], 0.0)

    # conv_layers: [ConvTranspose1d + BatchNorm1d(eval) + ReLU] * layer_num
    p = 3
    for _ in range(n_inner):
        m_ref, sc_ref, sh_ref = refs[p], refs[p + 1], refs[p + 2]
        p += 3
        h = jnp.dot(h, m_ref[...], preferred_element_type=jnp.float32)
        h = jnp.maximum(h * sc_ref[...] + sh_ref[...], 0.0)

    # last ConvTranspose1d + Tanh   -> flat layout col = channel*DATA_SIZE + t
    m_last_ref, sh_last_ref = refs[p], refs[p + 1]
    p += 2
    h = jnp.tanh(jnp.dot(h, m_last_ref[...], preferred_element_type=jnp.float32)
                 + sh_last_ref[...])

    # predict_layers: Linear (output zero-padded to 128 lanes for a dense store)
    pw_ref, pb_ref = refs[p], refs[p + 1]
    y = jnp.dot(h, pw_ref[...], preferred_element_type=jnp.float32) + pb_ref[...]
    out_ref[...] = y.astype(out_ref.dtype)


# -------------------------- host-side parameter preparation --------------------------
def convtranspose1d_as_matrix(w, lin, stride=2, pad=1):
    """Lower ConvTranspose1d(k=4, s=2, p=1) to a dense (Cin*Lin, Cout*Lout) matrix.

    Input flat layout  : ci*Lin + i   (row-major view of (C, L))
    Output flat layout : co*Lout + j
    """
    w = np.asarray(w, np.float32)
    cin, cout, k = w.shape
    lout = (lin - 1) * stride - 2 * pad + k
    m = np.zeros((cin * lin, cout * lout), np.float32)
    for ci in range(cin):
        for i in range(lin):
            for kk in range(k):
                j = i * stride - pad + kk
                if 0 <= j < lout:
                    m[ci * lin + i, np.arange(cout) * lout + j] += w[ci, :, kk]
    return m, lout


def init_prepared_params(key):
    """Random (deterministic) module parameters, pre-lowered to kernel-ready matrices."""
    ks = jax.random.split(key, 16)
    kit = iter(ks)

    def u(shape, lo, hi):
        return np.asarray(jax.random.uniform(next(kit), shape, jnp.float32, lo, hi))

    n0 = FINAL_SIZE * MAX_CHANNEL                      # 128
    lin_w = u((LATENT_SIZE, n0), -0.3, 0.3)
    lin_b = u((n0,), -0.1, 0.1)

    convs = []
    prev_c, lin_len = MAX_CHANNEL, FINAL_SIZE
    for i in range(LAYER_NUM):
        out_c = MAX_CHANNEL // 2 ** (i + 1)
        w = u((prev_c, out_c, 4), -0.2, 0.2)
        b = u((out_c,), -0.1, 0.1)
        gamma = np.ones((out_c,), np.float32)          # fresh BatchNorm1d values
        beta = np.zeros((out_c,), np.float32)
        rm = np.zeros((out_c,), np.float32)
        rv = np.ones((out_c,), np.float32)
        # TODO(synk): BatchNorm1d train-mode batch statistics not implemented;
        #             eval-mode running-stat affine is fused into the matmul.
        M, lout = convtranspose1d_as_matrix(w, lin_len)
        sc_ch = gamma / np.sqrt(rv + BN_EPS)
        sh_ch = sc_ch * (b - rm) + beta                # folds the conv bias too
        convs.append(dict(
            M=jnp.asarray(M),
            scale=jnp.asarray(np.repeat(sc_ch, lout).astype(np.float32).reshape(1, -1)),
            shift=jnp.asarray(np.repeat(sh_ch, lout).astype(np.float32).reshape(1, -1)),
        ))
        prev_c, lin_len = out_c, lout

    w_last = u((prev_c, INPUT_CHANNEL, 4), -0.2, 0.2)
    b_last = u((INPUT_CHANNEL,), -0.1, 0.1)
    M_last, lout = convtranspose1d_as_matrix(w_last, lin_len)
    assert lout == DATA_SIZE
    last_shift = np.repeat(b_last, lout).astype(np.float32).reshape(1, -1)

    pred_w = u((DATA_SIZE * INPUT_CHANNEL, PRED_OUT), -0.05, 0.05)
    pred_b = u((PRED_OUT,), -0.05, 0.05)
    pred_w_pad = np.zeros((DATA_SIZE * INPUT_CHANNEL, LANE_PAD), np.float32)
    pred_w_pad[:, :PRED_OUT] = pred_w
    pred_b_pad = np.zeros((1, LANE_PAD), np.float32)
    pred_b_pad[0, :PRED_OUT] = pred_b

    return dict(
        lin_w=jnp.asarray(lin_w),
        lin_b=jnp.asarray(lin_b.reshape(1, -1)),
        convs=convs,
        last_M=jnp.asarray(M_last),
        last_shift=jnp.asarray(last_shift),
        pred_w_pad=jnp.asarray(pred_w_pad),
        pred_b_pad=jnp.asarray(pred_b_pad),
    )


# --------------------------------- forward (module) ---------------------------------
def _forward_impl(prep, z):
    B = z.shape[0]
    args = [z, prep["lin_w"], prep["lin_b"]]
    for layer in prep["convs"]:
        args += [layer["M"], layer["scale"], layer["shift"]]
    args += [prep["last_M"], prep["last_shift"], prep["pred_w_pad"], prep["pred_b_pad"]]

    vmem_spec = pl.BlockSpec(memory_space=pltpu.MemorySpace.VMEM)
    out_pad = pl.pallas_call(
        functools.partial(_decoder_kernel, n_inner=len(prep["convs"])),
        out_shape=jax.ShapeDtypeStruct((B, LANE_PAD), jnp.float32),
        in_specs=[vmem_spec] * len(args),
        out_specs=vmem_spec,
    )(*args)

    # strip the lane padding and reproduce .view(-1, pred_steps, input_channel)
    return out_pad[:, :PRED_OUT].reshape(B, PRED_STEPS, INPUT_CHANNEL)


forward = jax.jit(_forward_impl)


if __name__ == "__main__":
    key = jax.random.PRNGKey(0)
    pkey, zkey = jax.random.split(key)
    prep = init_prepared_params(pkey)
    z = jax.random.normal(zkey, (BATCH, LATENT_SIZE), jnp.float32)

    out = forward(prep, z)
    jax.block_until_ready(out)

    assert out.shape == (BATCH, PRED_STEPS, INPUT_CHANNEL)
    assert bool(jnp.all(jnp.isfinite(out)))
    print("KERNEL_OK")
</pallas_src>

<mosaic_0001>
module attributes {stable_mosaic.version = 11 : i64} {
  func.func @_decoder_kernel(%arg0: memref<2x8xf32, #tpu.memory_space<vmem>>, %arg1: memref<8x128xf32, #tpu.memory_space<vmem>>, %arg2: memref<1x128xf32, #tpu.memory_space<vmem>>, %arg3: memref<128x128xf32, #tpu.memory_space<vmem>>, %arg4: memref<1x128xf32, #tpu.memory_space<vmem>>, %arg5: memref<1x128xf32, #tpu.memory_space<vmem>>, %arg6: memref<128x64xf32, #tpu.memory_space<vmem>>, %arg7: memref<1x64xf32, #tpu.memory_space<vmem>>, %arg8: memref<64x128xf32, #tpu.memory_space<vmem>>, %arg9: memref<1x128xf32, #tpu.memory_space<vmem>>, %arg10: memref<2x128xf32, #tpu.memory_space<vmem>>) attributes {dimension_semantics = [], scalar_prefetch = 0 : i64, scratch_operands = 0 : i64, tpu.core_type = #tpu.core_type<tc>} {
    %c0 = arith.constant 0 : index
    %c0_0 = arith.constant 0 : index
    %0 = vector.load %arg0[%c0, %c0_0] : memref<2x8xf32, #tpu.memory_space<vmem>>, vector<2x8xf32>
    %c0_1 = arith.constant 0 : index
    %c0_2 = arith.constant 0 : index
    %1 = vector.load %arg1[%c0_1, %c0_2] : memref<8x128xf32, #tpu.memory_space<vmem>>, vector<8x128xf32>
    %cst = arith.constant dense<0.000000e+00> : vector<2x128xf32>
    %2 = tpu.matmul %0, %1, %cst {dimension_numbers = #tpu.dot_dimension_numbers<[1], [0], [0], [1], [0, 0, 1, 1], [], []>} : vector<2x8xf32>, vector<8x128xf32>, vector<2x128xf32> -> vector<2x128xf32>
    %c0_3 = arith.constant 0 : index
    %c0_4 = arith.constant 0 : index
    %3 = vector.load %arg2[%c0_3, %c0_4] : memref<1x128xf32, #tpu.memory_space<vmem>>, vector<1x128xf32>
    %4 = vector.broadcast %3 : vector<1x128xf32> to vector<2x128xf32>
    %5 = arith.addf %2, %4 : vector<2x128xf32>
    %cst_5 = arith.constant 0.000000e+00 : f32
    %6 = vector.broadcast %cst_5 : f32 to vector<2x128xf32>
    %7 = arith.maximumf %5, %6 : vector<2x128xf32>
    %c0_6 = arith.constant 0 : index
    %c0_7 = arith.constant 0 : index
    %8 = vector.load %arg3[%c0_6, %c0_7] : memref<128x128xf32, #tpu.memory_space<vmem>>, vector<128x128xf32>
    %cst_8 = arith.constant dense<0.000000e+00> : vector<2x128xf32>
    %9 = tpu.matmul %7, %8, %cst_8 {dimension_numbers = #tpu.dot_dimension_numbers<[1], [0], [0], [1], [0, 0, 1, 1], [], []>} : vector<2x128xf32>, vector<128x128xf32>, vector<2x128xf32> -> vector<2x128xf32>
    %c0_9 = arith.constant 0 : index
    %c0_10 = arith.constant 0 : index
    %10 = vector.load %arg4[%c0_9, %c0_10] : memref<1x128xf32, #tpu.memory_space<vmem>>, vector<1x128xf32>
    %11 = vector.broadcast %10 : vector<1x128xf32> to vector<2x128xf32>
    %12 = arith.mulf %9, %11 : vector<2x128xf32>
    %c0_11 = arith.constant 0 : index
    %c0_12 = arith.constant 0 : index
    %13 = vector.load %arg5[%c0_11, %c0_12] : memref<1x128xf32, #tpu.memory_space<vmem>>, vector<1x128xf32>
    %14 = vector.broadcast %13 : vector<1x128xf32> to vector<2x128xf32>
    %15 = arith.addf %12, %14 : vector<2x128xf32>
    %cst_13 = arith.constant 0.000000e+00 : f32
    %16 = vector.broadcast %cst_13 : f32 to vector<2x128xf32>
    %17 = arith.maximumf %15, %16 : vector<2x128xf32>
    %c0_14 = arith.constant 0 : index
    %c0_15 = arith.constant 0 : index
    %18 = vector.load %arg6[%c0_14, %c0_15] : memref<128x64xf32, #tpu.memory_space<vmem>>, vector<128x64xf32>
    %cst_16 = arith.constant dense<0.000000e+00> : vector<2x64xf32>
    %19 = tpu.matmul %17, %18, %cst_16 {dimension_numbers = #tpu.dot_dimension_numbers<[1], [0], [0], [1], [0, 0, 1, 1], [], []>} : vector<2x128xf32>, vector<128x64xf32>, vector<2x64xf32> -> vector<2x64xf32>
    %c0_17 = arith.constant 0 : index
    %c0_18 = arith.constant 0 : index
    %20 = vector.load %arg7[%c0_17, %c0_18] : memref<1x64xf32, #tpu.memory_space<vmem>>, vector<1x64xf32>
    %21 = vector.broadcast %20 : vector<1x64xf32> to vector<2x64xf32>
    %22 = arith.addf %19, %21 : vector<2x64xf32>
    %23 = math.tanh %22 : vector<2x64xf32>
    %c0_19 = arith.constant 0 : index
    %c0_20 = arith.constant 0 : index
    %24 = vector.load %arg8[%c0_19, %c0_20] : memref<64x128xf32, #tpu.memory_space<vmem>>, vector<64x128xf32>
    %cst_21 = arith.constant dense<0.000000e+00> : vector<2x128xf32>
    %25 = tpu.matmul %23, %24, %cst_21 {dimension_numbers = #tpu.dot_dimension_numbers<[1], [0], [0], [1], [0, 0, 1, 1], [], []>} : vector<2x64xf32>, vector<64x128xf32>, vector<2x128xf32> -> vector<2x128xf32>
    %c0_22 = arith.constant 0 : index
    %c0_23 = arith.constant 0 : index
    %26 = vector.load %arg9[%c0_22, %c0_23] : memref<1x128xf32, #tpu.memory_space<vmem>>, vector<1x128xf32>
    %27 = vector.broadcast %26 : vector<1x128xf32> to vector<2x128xf32>
    %28 = arith.addf %25, %27 : vector<2x128xf32>
    %c0_24 = arith.constant 0 : index
    %c0_25 = arith.constant 0 : index
    %29 = vector.load %arg10[%c0_24, %c0_25] : memref<2x128xf32, #tpu.memory_space<vmem>>, vector<2x128xf32>
    tpu.vector_store %arg10[%c0_24, %c0_25], %28 {strides = array<i32>} : memref<2x128xf32, #tpu.memory_space<vmem>>, vector<2x128xf32>,
    return
  }
}

</mosaic_0001>

<bundles_post_ra>
// kernel: _forward_impl.1
= control target key start
LH: loop header
LB: loop body
LE: loop exit
PB: predicated region body
PF: predicated region fallthrough
CT: control target
= control target key end

     0   :  { %15 = vsyncpa [#allocation3], 0  ;;  %s610_s0 = inlined_call_operand.vmem [shape: f32[2,8], index: 0, kind: input, shape index: {}]   ;;  %s611_s1 = inlined_call_operand.hbm [shape: f32[8,128], index: 1, kind: input, shape index: {}]   ;;  %s612_s2 = inlined_call_operand.hbm [shape: f32[1,128], index: 2, kind: input, shape index: {}]   ;;  %s613_s3 = inlined_call_operand.vmem [shape: f32[128,128], index: 3, kind: input, shape index: {}]   ;;  %s614_s4 = inlined_call_operand.hbm [shape: f32[1,128], index: 4, kind: input, shape index: {}]   ;;  %s615_s5 = inlined_call_operand.hbm [shape: f32[1,128], index: 5, kind: input, shape index: {}]   ;;  %s616_s6 = inlined_call_operand.vmem [shape: f32[128,64], index: 6, kind: input, shape index: {}]   ;;  %s617_s7 = inlined_call_operand.hbm [shape: f32[1,64], index: 7, kind: input, shape index: {}]   ;;  %s618_s8 = inlined_call_operand.vmem [shape: f32[64,128], index: 8, kind: input, shape index: {}]   ;;  %s619_s9 = inlined_call_operand.vmem [shape: f32[1,128], index: 9, kind: input, shape index: {}]   ;;  %s620_s10 = inlined_call_operand.vmem [shape: f32[2,128], index: 10, kind: output, shape index: {}]  }
   0x1   :  { %16 = vsyncpa [#allocation5], 0  ;;  %s36_s15 = sshll.u32 %s612_s2, 4  ;;  %s37_s15 = int_to_ptr.hbm [resolvable:$true] %s36_s15 }
   0x2   :  { %17 = vsyncpa [#allocation8], 0  ;;  %s406_s16 = smov [#allocation4]   ;;  %s60_s20 = sshll.u32 %s615_s5, 4  ;;  %s61_s20 = int_to_ptr.hbm [resolvable:$true] %s60_s20 }
   0x3   :  { %s38_s17 = sshll.u32 %s406_s16, 4  ;;  %s407_s21 = smov [#allocation7]   ;;  %s39_s17 = int_to_ptr.vmem [resolvable:$true] %s38_s17 }
   0x4   :  { %41 = dma.hbm_to_vmem [thread:$0]  %s37_s15, 16, %s39_s17, [#allocation5]  }
   0x5   :  { %s62_s22 = sshll.u32 %s407_s21, 4  ;;  %s25_s25 = sshll.u32 %s611_s1, 4  ;;  %s63_s22 = int_to_ptr.vmem [resolvable:$true] %s62_s22  ;;  %s26_s25 = int_to_ptr.hbm [resolvable:$true] %s25_s25 }
   0x6   :  { %65 = dma.hbm_to_vmem [thread:$0]  %s61_s20, 16, %s63_s22, [#allocation8]  }
   0x7   :  { %s49_s27 = sshll.u32 %s614_s4, 4  ;;  %s408_s28 = smov [#allocation2]   ;;  %s50_s27 = int_to_ptr.hbm [resolvable:$true] %s49_s27 }
   0x8   :  { %s27_s29 = sshll.u32 %s408_s28, 4  ;;  %s409_s5 = smov [#allocation6]   ;;  %s28_s29 = int_to_ptr.vmem [resolvable:$true] %s27_s29 }
   0x9   :  { %30 = dma.hbm_to_vmem [thread:$0]  %s26_s25, 128, %s28_s29, [#allocation3]  }
   0xa   :  { %s51_s30 = sshll.u32 %s409_s5, 4  ;;  %s73_s13 = sshll.u32 %s617_s7, 4  ;;  %s52_s30 = int_to_ptr.vmem [resolvable:$true] %s51_s30  ;;  %s74_s13 = int_to_ptr.hbm [resolvable:$true] %s73_s13 }
   0xb   :  { %54 = dma.hbm_to_vmem [thread:$0]  %s50_s27, 16, %s52_s30, [#allocation5]  }
   0xc   :  { %s410_s1 = smov [#allocation9]  }
   0xd   :  { %s75_s14 = sshll.u32 %s410_s1, 4  ;;  %s76_s14 = int_to_ptr.vmem [resolvable:$true] %s75_s14 }
   0xe   :  { %78 = dma.hbm_to_vmem [thread:$0]  %s74_s13, 16, %s76_s14, [#allocation8]  }
   0xf   :  { %400 = dma.done.wait [#allocation3], 128  }
  0x10   :  { %401 = vsyncadd [#allocation3], 4294967168 }
  0x11   :  { %402 = dma.done.wait [#allocation5], 32  }
  0x12   :  { %403 = vsyncadd [#allocation5], 4294967264 }
  0x13   :  { %404 = dma.done.wait [#allocation8], 32  }
  0x14   :  { %405 = vsyncadd [#allocation8], 4294967264  ;;  %vm109_vm0 = vcmask 64512   ;;  %v104_v0 = vld [vmem:[#allocation2] sm:$0xff]  ;;  %v149_v2 = vld [vmem:[%s613_s3 + $0x78] sm:$0xff]  ;;  %vm234_vm1 = vcmask 523264  }
  0x15   :  { %v103_v1 = vld [vmem:[%s610_s0] sm:$0x3]  ;;  %128 = vmatpush.msra.mxu0 %v104_v0  ;;  %150 = vmatpush.msra.mxu1 %v149_v2  ;;  %v148_v3 = vld [vmem:[%s613_s3 + $0x70] sm:$0xff]  ;;  %v147_v4 = vld [vmem:[%s613_s3 + $0x68] sm:$0xff] }
  0x16   :  { %266 = vmatmul.msk.f32.vlgmr.msra.gmra.mxu0 %vm109_vm0, %v103_v1  ;;  %v146_v5 = vld [vmem:[%s613_s3 + $0x60] sm:$0xff]  ;;  %v145_v6 = vld [vmem:[%s613_s3 + $0x58] sm:$0xff]  ;;  %v144_v7 = vld [vmem:[%s613_s3 + $0x50] sm:$0xff] }
  0x17   :  { %151 = vmatpush.msra.mxu1 %v148_v3  ;;  %v143_v8 = vld [vmem:[%s613_s3 + $0x48] sm:$0xff]  ;;  %v142_v9 = vld [vmem:[%s613_s3 + $0x40] sm:$0xff]  ;;  %v141_v10 = vld [vmem:[%s613_s3 + $0x38] sm:$0xff] }
  0x18   :  { %v140_v11 = vld [vmem:[%s613_s3 + $0x30] sm:$0xff]  ;;  %v139_v12 = vld [vmem:[%s613_s3 + $0x28] sm:$0xff]  ;;  %v138_v13 = vld [vmem:[%s613_s3 + $0x20] sm:$0xff] }
  0x19   :  { %152 = vmatpush.msra.mxu1 %v147_v4  ;;  %v137_v14 = vld [vmem:[%s613_s3 + $0x18] sm:$0xff]  ;;  %v136_v15 = vld [vmem:[%s613_s3 + $0x10] sm:$0xff]  ;;  %v135_v16 = vld [vmem:[%s613_s3 + $0x8] sm:$0xff] }
  0x1a   :  { %v134_v17 = vld [vmem:[%s613_s3] sm:$0xff]  ;;  %v196_v18 = vld [vmem:[%s616_s6 + $0x78] sm:$0xff]  ;;  %v195_v19 = vld [vmem:[%s616_s6 + $0x70] sm:$0xff] }
  0x1b   :  { %153 = vmatpush.msra.mxu1 %v146_v5  ;;  %201 = vmatpush.msra.mxu2 %v196_v18  ;;  %v194_v20 = vld [vmem:[%s616_s6 + $0x68] sm:$0xff]  ;;  %v193_v21 = vld [vmem:[%s616_s6 + $0x60] sm:$0xff]  ;;  %v192_v22 = vld [vmem:[%s616_s6 + $0x58] sm:$0xff] }
  0x1c   :  { %v191_v23 = vld [vmem:[%s616_s6 + $0x50] sm:$0xff]  ;;  %v190_v24 = vld [vmem:[%s616_s6 + $0x48] sm:$0xff]  ;;  %v189_v25 = vld [vmem:[%s616_s6 + $0x40] sm:$0xff] }
  0x1d   :  { %154 = vmatpush.msra.mxu1 %v145_v6  ;;  %202 = vmatpush.msra.mxu2 %v195_v19  ;;  %v188_v26 = vld [vmem:[%s616_s6 + $0x38] sm:$0xff]  ;;  %v187_v27 = vld [vmem:[%s616_s6 + $0x30] sm:$0xff]  ;;  %v186_v28 = vld [vmem:[%s616_s6 + $0x28] sm:$0xff] }
  0x1e   :  { %v185_v29 = vld [vmem:[%s616_s6 + $0x20] sm:$0xff]  ;;  %v273_v30 = vld [vmem:[#allocation4] ss:$0 sm:$0xff]  ;;  %v184_v34 = vld [vmem:[%s616_s6 + $0x18] sm:$0xff] }
  0x1f   :  { %155 = vmatpush.msra.mxu1 %v144_v7  ;;  %203 = vmatpush.msra.mxu2 %v194_v20  ;;  %v183_v35 = vld [vmem:[%s616_s6 + $0x10] sm:$0xff]  ;;  %v182_v36 = vld [vmem:[%s616_s6 + $0x8] sm:$0xff]  ;;  %v181_v37 = vld [vmem:[%s616_s6] sm:$0xff] }
  0x20   :  { %v229_v38 = vld [vmem:[%s618_s8 + $0x38] sm:$0xff]  ;;  %v228_v39 = vld [vmem:[%s618_s8 + $0x30] sm:$0xff]  ;;  %v227_v40 = vld [vmem:[%s618_s8 + $0x28] sm:$0xff] }
  0x21   :  { %156 = vmatpush.msra.mxu1 %v143_v8  ;;  %204 = vmatpush.msra.mxu2 %v193_v21  ;;  %v274_v41 = vld [vmem:[#allocation6] ss:$0 sm:$0xff]  ;;  %v275_v42 = vld [vmem:[#allocation7] ss:$0 sm:$0xff]  ;;  %v226_v47 = vld [vmem:[%s618_s8 + $0x20] sm:$0xff] }
  0x22   :  { %246 = vmatpush.msra.mxu3 %v229_v38  ;;  %v225_v48 = vld [vmem:[%s618_s8 + $0x18] sm:$0xff]  ;;  %v224_v49 = vld [vmem:[%s618_s8 + $0x10] sm:$0xff]  ;;  %v223_v50 = vld [vmem:[%s618_s8 + $0x8] sm:$0xff] }
  0x23   :  { %157 = vmatpush.msra.mxu1 %v142_v9  ;;  %205 = vmatpush.msra.mxu2 %v192_v22  ;;  %v222_v51 = vld [vmem:[%s618_s8] sm:$0xff]  ;;  %v276_v52 = vld [vmem:[#allocation9] ss:$0 sm:$0xff] }
  0x24   :  { %247 = vmatpush.msra.mxu3 %v228_v39  ;;  %v277_v56 = vld [vmem:[%s619_s9] ss:$0 sm:$0xff] }
  0x25   :  { %158 = vmatpush.msra.mxu1 %v141_v10  ;;  %206 = vmatpush.msra.mxu2 %v191_v23 }
  0x26   :  { %248 = vmatpush.msra.mxu3 %v227_v40 }
  0x27   :  { %159 = vmatpush.msra.mxu1 %v140_v11  ;;  %207 = vmatpush.msra.mxu2 %v190_v24 }
  0x28   :  { %249 = vmatpush.msra.mxu3 %v226_v47 }
  0x29   :  { %160 = vmatpush.msra.mxu1 %v139_v12  ;;  %208 = vmatpush.msra.mxu2 %v189_v25 }
  0x2a   :  { %250 = vmatpush.msra.mxu3 %v225_v48 }
  0x2b   :  { %161 = vmatpush.msra.mxu1 %v138_v13  ;;  %209 = vmatpush.msra.mxu2 %v188_v26 }
  0x2c   :  { %251 = vmatpush.msra.mxu3 %v224_v49 }
  0x2d   :  { %162 = vmatpush.msra.mxu1 %v137_v14  ;;  %210 = vmatpush.msra.mxu2 %v187_v27 }
  0x2e   :  { %252 = vmatpush.msra.mxu3 %v223_v50 }
  0x2f   :  { %163 = vmatpush.msra.mxu1 %v136_v15  ;;  %211 = vmatpush.msra.mxu2 %v186_v28 }
  0x30   :  { %253 = vmatpush.msra.mxu3 %v222_v51 }
  0x31   :  { %164 = vmatpush.msra.mxu1 %v135_v16  ;;  %212 = vmatpush.msra.mxu2 %v185_v29 }
  0x33   :  { %165 = vmatpush.msra.mxu1 %v134_v17  ;;  %213 = vmatpush.msra.mxu2 %v184_v34 }
  0x35   :  { %214 = vmatpush.msra.mxu2 %v183_v35 }
  0x37   :  { %215 = vmatpush.msra.mxu2 %v182_v36 }
  0x39   :  { %216 = vmatpush.msra.mxu2 %v181_v37 }
  0x93   :  { %v130_v31 = vpop.f32.mrf.mxu0 }
  0x94   :  { %v131_v32 = vadd.f32 %v273_v30, %v130_v31 }
  0x96   :  { %v133_v33 = vmax.f32 %v131_v32, 0.0 }
  0x98   :  { %166 = vmatmul.f32.vlgmr.msra.gmra.mxu1 %v133_v33 }
 0x115   :  { %v167_v43 = vpop.f32.mrf.mxu1 }
 0x116   :  { %v174_v44 = vmul.f32 %v274_v41, %v167_v43 }
 0x118   :  { %v179_v45 = vadd.f32 %v275_v42, %v174_v44 }
 0x11a   :  { %v180_v46 = vmax.f32 %v179_v45, 0.0 }
 0x11c   :  { %217 = vmatmul.f32.vlgmr.msra.gmra.mxu2 %v180_v46 }
 0x19f   :  { %v218_v53 = vpop.f32.mrf.mxu2 }
 0x1a0   :  { %v219_v54 = vadd.f32 %v276_v52, %v218_v53 }
 0x1a2   :  { %278 = vtanh.f32 %v219_v54 }
 0x1a8   :  { %v279_v55 = vpop.eup %278 }
 0x1a9   :  { %267 = vmatmul.msk.f32.vlgmr.msra.gmra.mxu3 %vm234_vm1, %v279_v55 }
 0x22c   :  { %v255_v57 = vpop.f32.mrf.mxu3 }
 0x22d   :  { %v256_v58 = vadd.f32 %v277_v56, %v255_v57 }
 0x22f   :  { %258 = vst [vmem:[%s620_s10] sm:$0x3] %v256_v58 }
 0x230   :  { %263 = vsyncpa [#allocation3], 1 }
 0x231   :  { %264 = vsyncpa [#allocation5], 1 }
 0x232   :  { %265 = vsyncpa [#allocation8], 1 }

</bundles_post_ra>
